<compile_context>
chip_gen: v6e
topology: v6e:2x2x1
jax: 0.10.0
libtpu: 0.0.40
codegen_flags: <defaults>
</compile_context>

<pallas_src>
import math

import jax
import jax.numpy as jnp
from jax.experimental import pallas as pl
from jax.experimental.pallas import tpu as pltpu


def _make_kernel(batch_tile, group_size, L, eps):
    inv_count = 1.0 / float(L * group_size)  # 1 / elements per (batch, group)

    def kernel(x_ref, gp_ref, gammaT_ref, betaT_ref, ws_ref, c0_ref,
               vwoT_ref, bo_ref, o_ref):
        # Hoist constant loads out of the per-batch loop.
        gp = gp_ref[...]          # (n, n) group-membership mask (block-diag ones)
        ws = ws_ref[...]          # (M, n) scaled scores weight  (K@Wq^T)/sqrt(n)
        c0 = c0_ref[...]          # (M, 1) scaled scores bias    (K@bq)/sqrt(n)
        gammaT = gammaT_ref[...]  # (1, n)
        betaT = betaT_ref[...]    # (1, n)
        vwoT = vwoT_ref[...]      # (n, M) fused epilogue weight (V@Wout)^T
        bo = bo_ref[...]          # (n, 1)

        for bi in range(batch_tile):          # short static loop over batches
            x = x_ref[bi]                     # (n, L): channels on sublanes, L on lanes

            # ---- GroupNorm statistics: reduce over L first, then group-combine.
            rs = jnp.sum(x, axis=1, keepdims=True)        # (n, 1)
            rss = jnp.sum(x * x, axis=1, keepdims=True)   # (n, 1)
            # Group sums in lane orientation (1, n): gp is symmetric, so a
            # sublane reduce of gp * rs gives per-channel group totals.
            meanT = jnp.sum(gp * rs, axis=0, keepdims=True) * inv_count   # (1, n)
            ex2T = jnp.sum(gp * rss, axis=0, keepdims=True) * inv_count   # (1, n)
            varT = ex2T - meanT * meanT                                   # biased var
            gT = jax.lax.rsqrt(varT + eps) * gammaT                       # (1, n)
            sftT = betaT - meanT * gT                                     # (1, n)

            # ---- scores with GroupNorm affine folded into the weight:
            #      aT = (Ws * g^T) @ x + (Ws @ sft + c0)
            bias = jnp.sum(ws * sftT, axis=1, keepdims=True) + c0         # (M, 1)
            aT = jnp.dot(ws * gT, x,
                         preferred_element_type=jnp.float32) + bias       # (M, L)

            # ---- softmax over the M y-tokens (sublane axis)
            aT = aT - jnp.max(aT, axis=0, keepdims=True)
            p = jnp.exp(aT)
            denom = jnp.sum(p, axis=0, keepdims=True)                     # (1, L)
            r = pl.reciprocal(denom, approx=True)                         # EUP vrcp
            r = r * (2.0 - denom * r)                                     # 1 Newton step
            p = p * r

            # ---- fused epilogue: p @ (V @ Wout) + bo
            outT = jnp.dot(vwoT, p,
                           preferred_element_type=jnp.float32) + bo       # (n, L)
            o_ref[bi] = outT.astype(o_ref.dtype)

    return kernel


def cross_attention_pallas(x, y, params, norm_groups):
    b, n, H, W, D = x.shape
    L = H * W * D
    M = y.shape[0]
    G = norm_groups
    gs = n // G
    scale = 1.0 / math.sqrt(n)

    # channels-first, no HBM transpose (pure reshape)
    x3 = x.reshape(b, n, L)                                             # (b, n, L)

    # group-membership mask: ones within each contiguous channel group
    group_id = jnp.arange(n) // gs
    gp = (group_id[:, None] == group_id[None, :]).astype(jnp.float32)  # (n, n)

    gammaT = params["gamma"].reshape(1, n)
    betaT = params["beta"].reshape(1, n)

    # ---- batch-invariant precomputes (done once, outside the grid) ----------
    k = y @ params["wk"] + params["bk"]                                 # (M, yc)
    ws = (k @ params["wq"].T) * scale                                   # (M, n)
    c0 = (k @ params["bq"]).reshape(M, 1) * scale                       # (M, 1)
    vwoT = ((y @ params["wv"] + params["bv"]) @ params["wo"]).T         # (n, M)
    bo = params["bo"].reshape(n, 1)                                     # (n, 1)

    # ---- batch-blocked grid: move more data per step at tiny shapes ---------
    bt = 1
    for cand in (8, 4, 2):
        if b % cand == 0 and cand <= b:
            bt = cand
            break

    kernel = _make_kernel(bt, gs, L, 1e-5)
    full2 = lambda i: (0, 0)

    out = pl.pallas_call(
        kernel,
        out_shape=jax.ShapeDtypeStruct((b, n, L), x.dtype),
        grid_spec=pltpu.PrefetchScalarGridSpec(
            num_scalar_prefetch=0,
            grid=(b // bt,),
            in_specs=[
                pl.BlockSpec((bt, n, L), lambda i: (i, 0, 0)),  # x (batch block)
                pl.BlockSpec((n, n), full2),                    # group mask
                pl.BlockSpec((1, n), full2),                    # gamma^T
                pl.BlockSpec((1, n), full2),                    # beta^T
                pl.BlockSpec((M, n), full2),                    # Ws = (K@Wq^T)/sqrt(n)
                pl.BlockSpec((M, 1), full2),                    # c0 = (K@bq)/sqrt(n)
                pl.BlockSpec((n, M), full2),                    # (V@Wout)^T
                pl.BlockSpec((n, 1), full2),                    # bout
            ],
            out_specs=pl.BlockSpec((bt, n, L), lambda i: (i, 0, 0)),
        ),
        compiler_params=pltpu.CompilerParams(
            dimension_semantics=("parallel",),
            vmem_limit_bytes=32 * 1024 * 1024,
        ),
    )(x3, gp, gammaT, betaT, ws, c0, vwoT, bo)

    return out.reshape(b, n, H, W, D)


def cross_attention_ref(x, y, params, norm_groups):
    """Pure-JAX reference mirroring the PyTorch forward."""
    b, n, H, W, D = x.shape
    G = norm_groups
    gs = n // G
    xr = x.reshape(b, G, gs, H, W, D)
    mean = xr.mean(axis=(2, 3, 4, 5), keepdims=True)
    var = xr.var(axis=(2, 3, 4, 5), keepdims=True)  # biased, like torch GroupNorm
    xn = (xr - mean) / jnp.sqrt(var + 1e-5)
    xn = xn.reshape(b, n, H, W, D)
    xn = xn * params["gamma"].reshape(1, n, 1, 1, 1) + params["beta"].reshape(1, n, 1, 1, 1)
    xn = jnp.transpose(xn.reshape(b, n, -1), (0, 2, 1))          # (b, L, n)
    q = xn @ params["wq"] + params["bq"]                          # (b, L, yc)
    k = y @ params["wk"] + params["bk"]                           # (M, yc)
    v = y @ params["wv"] + params["bv"]                           # (M, yc)
    attn = (q @ k.T) / math.sqrt(n)                               # (b, L, M)
    attn = jax.nn.softmax(attn, axis=-1)
    out = attn @ v                                                # (b, L, yc)
    out = out @ params["wo"] + params["bo"]                       # (b, L, n)
    return jnp.transpose(out, (0, 2, 1)).reshape(b, n, H, W, D)


if __name__ == "__main__":
    # small shapes consistent with the module's forward
    b, x_channel, H, W, D = 2, 32, 4, 4, 4
    y_channel = 32
    M = 8                    # number of y tokens (y must be 2-D for k.T)
    norm_groups = 16

    key = jax.random.PRNGKey(0)
    ks = jax.random.split(key, 10)

    def linear_init(kw, kb, fan_in, fan_out):
        bound = 1.0 / math.sqrt(fan_in)
        w = jax.random.uniform(kw, (fan_in, fan_out), jnp.float32, -bound, bound)
        bb = jax.random.uniform(kb, (fan_out,), jnp.float32, -bound, bound)
        return w, bb

    wq, bq = linear_init(ks[0], ks[1], x_channel, y_channel)   # q: x_channel -> y_channel
    wk, bk = linear_init(ks[2], ks[3], y_channel, y_channel)   # k: y_channel -> y_channel
    wv, bv = linear_init(ks[4], ks[5], y_channel, y_channel)   # v: y_channel -> y_channel
    wo, bo = linear_init(ks[6], ks[7], y_channel, x_channel)   # out: y_channel -> x_channel

    params = dict(
        gamma=jnp.ones((x_channel,), jnp.float32),
        beta=jnp.zeros((x_channel,), jnp.float32),
        wq=wq, bq=bq, wk=wk, bk=bk, wv=wv, bv=bv, wo=wo, bo=bo,
    )

    x = jax.random.normal(ks[8], (b, x_channel, H, W, D), jnp.float32)
    y = jax.random.normal(ks[9], (M, y_channel), jnp.float32)

    out = cross_attention_pallas(x, y, params, norm_groups)
    out = jax.block_until_ready(out)

    ref = cross_attention_ref(x, y, params, norm_groups)
    assert out.shape == (b, x_channel, H, W, D)
    max_err = float(jnp.max(jnp.abs(out - ref)))
    assert jnp.allclose(out, ref, atol=1e-4, rtol=1e-4), f"max abs err {max_err}"

    print("KERNEL_OK")
</pallas_src>

<mosaic_0001>
module attributes {stable_mosaic.version = 11 : i64} {
  func.func @kernel(%arg0: i32, %arg1: memref<2x32x64xf32, #tpu.memory_space<vmem>>, %arg2: memref<32x32xf32, #tpu.memory_space<vmem>>, %arg3: memref<1x32xf32, #tpu.memory_space<vmem>>, %arg4: memref<1x32xf32, #tpu.memory_space<vmem>>, %arg5: memref<8x32xf32, #tpu.memory_space<vmem>>, %arg6: memref<8x1xf32, #tpu.memory_space<vmem>>, %arg7: memref<32x8xf32, #tpu.memory_space<vmem>>, %arg8: memref<32x1xf32, #tpu.memory_space<vmem>>, %arg9: memref<2x32x64xf32, #tpu.memory_space<vmem>>) attributes {dimension_semantics = [#tpu.dimension_semantics<parallel>], iteration_bounds = array<i64: 1>, scalar_prefetch = 0 : i64, scratch_operands = 0 : i64, tpu.core_type = #tpu.core_type<tc>, window_params = [{transform_indices = @transform_0, window_bounds = array<i64: 2, 32, 64>}, {pipeline_mode = #tpu.pipeline_mode<synchronous>, transform_indices = @transform_1, window_bounds = array<i64: 32, 32>}, {pipeline_mode = #tpu.pipeline_mode<synchronous>, transform_indices = @transform_2, window_bounds = array<i64: 1, 32>}, {pipeline_mode = #tpu.pipeline_mode<synchronous>, transform_indices = @transform_3, window_bounds = array<i64: 1, 32>}, {pipeline_mode = #tpu.pipeline_mode<synchronous>, transform_indices = @transform_4, window_bounds = array<i64: 8, 32>}, {pipeline_mode = #tpu.pipeline_mode<synchronous>, transform_indices = @transform_5, window_bounds = array<i64: 8, 1>}, {pipeline_mode = #tpu.pipeline_mode<synchronous>, transform_indices = @transform_6, window_bounds = array<i64: 32, 8>}, {pipeline_mode = #tpu.pipeline_mode<synchronous>, transform_indices = @transform_7, window_bounds = array<i64: 32, 1>}, {transform_indices = @transform_8, window_bounds = array<i64: 2, 32, 64>}]} {
    %c0 = arith.constant 0 : index
    %c0_0 = arith.constant 0 : index
    %0 = vector.load %arg2[%c0, %c0_0] : memref<32x32xf32, #tpu.memory_space<vmem>>, vector<32x32xf32>
    %c0_1 = arith.constant 0 : index
    %c0_2 = arith.constant 0 : index
    %1 = vector.load %arg5[%c0_1, %c0_2] : memref<8x32xf32, #tpu.memory_space<vmem>>, vector<8x32xf32>
    %c0_3 = arith.constant 0 : index
    %c0_4 = arith.constant 0 : index
    %2 = vector.load %arg6[%c0_3, %c0_4] : memref<8x1xf32, #tpu.memory_space<vmem>>, vector<8x1xf32>
    %c0_5 = arith.constant 0 : index
    %c0_6 = arith.constant 0 : index
    %3 = vector.load %arg3[%c0_5, %c0_6] : memref<1x32xf32, #tpu.memory_space<vmem>>, vector<1x32xf32>
    %c0_7 = arith.constant 0 : index
    %c0_8 = arith.constant 0 : index
    %4 = vector.load %arg4[%c0_7, %c0_8] : memref<1x32xf32, #tpu.memory_space<vmem>>, vector<1x32xf32>
    %c0_9 = arith.constant 0 : index
    %c0_10 = arith.constant 0 : index
    %5 = vector.load %arg7[%c0_9, %c0_10] : memref<32x8xf32, #tpu.memory_space<vmem>>, vector<32x8xf32>
    %c0_11 = arith.constant 0 : index
    %c0_12 = arith.constant 0 : index
    %6 = vector.load %arg8[%c0_11, %c0_12] : memref<32x1xf32, #tpu.memory_space<vmem>>, vector<32x1xf32>
    %c0_13 = arith.constant 0 : index
    %c0_14 = arith.constant 0 : index
    %c0_15 = arith.constant 0 : index
    %7 = vector.load %arg1[%c0_13, %c0_14, %c0_15] : memref<2x32x64xf32, #tpu.memory_space<vmem>>, vector<1x32x64xf32>
    %8 = vector.shape_cast %7 : vector<1x32x64xf32> to vector<32x64xf32>
    %cst = arith.constant dense<0.000000e+00> : vector<32xf32>
    %9 = vector.multi_reduction <add>, %8, %cst [1] : vector<32x64xf32> to vector<32xf32>
    %10 = vector.shape_cast %9 : vector<32xf32> to vector<32x1xf32>
    %11 = arith.mulf %8, %8 : vector<32x64xf32>
    %cst_16 = arith.constant dense<0.000000e+00> : vector<32xf32>
    %12 = vector.multi_reduction <add>, %11, %cst_16 [1] : vector<32x64xf32> to vector<32xf32>
    %13 = vector.shape_cast %12 : vector<32xf32> to vector<32x1xf32>
    %14 = vector.broadcast %10 : vector<32x1xf32> to vector<32x32xf32>
    %15 = arith.mulf %0, %14 : vector<32x32xf32>
    %cst_17 = arith.constant dense<0.000000e+00> : vector<32xf32>
    %16 = vector.multi_reduction <add>, %15, %cst_17 [0] : vector<32x32xf32> to vector<32xf32>
    %17 = vector.shape_cast %16 : vector<32xf32> to vector<1x32xf32>
    %cst_18 = arith.constant 7.812500e-03 : f32
    %18 = vector.broadcast %cst_18 : f32 to vector<1x32xf32>
    %19 = arith.mulf %17, %18 : vector<1x32xf32>
    %20 = vector.broadcast %13 : vector<32x1xf32> to vector<32x32xf32>
    %21 = arith.mulf %0, %20 : vector<32x32xf32>
    %cst_19 = arith.constant dense<0.000000e+00> : vector<32xf32>
    %22 = vector.multi_reduction <add>, %21, %cst_19 [0] : vector<32x32xf32> to vector<32xf32>
    %23 = vector.shape_cast %22 : vector<32xf32> to vector<1x32xf32>
    %cst_20 = arith.constant 7.812500e-03 : f32
    %24 = vector.broadcast %cst_20 : f32 to vector<1x32xf32>
    %25 = arith.mulf %23, %24 : vector<1x32xf32>
    %26 = arith.mulf %19, %19 : vector<1x32xf32>
    %27 = arith.subf %25, %26 : vector<1x32xf32>
    %cst_21 = arith.constant 9.99999974E-6 : f32
    %28 = vector.broadcast %cst_21 : f32 to vector<1x32xf32>
    %29 = arith.addf %27, %28 : vector<1x32xf32>
    %30 = math.rsqrt %29 : vector<1x32xf32>
    %31 = arith.mulf %30, %3 : vector<1x32xf32>
    %32 = arith.mulf %19, %31 : vector<1x32xf32>
    %33 = arith.subf %4, %32 : vector<1x32xf32>
    %34 = vector.broadcast %33 : vector<1x32xf32> to vector<8x32xf32>
    %35 = arith.mulf %1, %34 : vector<8x32xf32>
    %cst_22 = arith.constant dense<0.000000e+00> : vector<8xf32>
    %36 = vector.multi_reduction <add>, %35, %cst_22 [1] : vector<8x32xf32> to vector<8xf32>
    %37 = vector.shape_cast %36 : vector<8xf32> to vector<8x1xf32>
    %38 = arith.addf %37, %2 : vector<8x1xf32>
    %39 = vector.broadcast %31 : vector<1x32xf32> to vector<8x32xf32>
    %40 = arith.mulf %1, %39 : vector<8x32xf32>
    %cst_23 = arith.constant dense<0.000000e+00> : vector<8x64xf32>
    %41 = tpu.matmul %40, %8, %cst_23 {dimension_numbers = #tpu.dot_dimension_numbers<[1], [0], [0], [1], [0, 0, 1, 1], [], []>} : vector<8x32xf32>, vector<32x64xf32>, vector<8x64xf32> -> vector<8x64xf32>
    %42 = vector.broadcast %38 : vector<8x1xf32> to vector<8x64xf32>
    %43 = arith.addf %41, %42 : vector<8x64xf32>
    %cst_24 = arith.constant dense<0xFF800000> : vector<64xf32>
    %44 = vector.multi_reduction <maximumf>, %43, %cst_24 [0] : vector<8x64xf32> to vector<64xf32>
    %45 = vector.shape_cast %44 : vector<64xf32> to vector<1x64xf32>
    %46 = vector.broadcast %45 : vector<1x64xf32> to vector<8x64xf32>
    %47 = arith.subf %43, %46 : vector<8x64xf32>
    %48 = math.exp %47 : vector<8x64xf32>
    %cst_25 = arith.constant dense<0.000000e+00> : vector<64xf32>
    %49 = vector.multi_reduction <add>, %48, %cst_25 [0] : vector<8x64xf32> to vector<64xf32>
    %50 = vector.shape_cast %49 : vector<64xf32> to vector<1x64xf32>
    %51 = tpu.reciprocal %50 {approx = true} : vector<1x64xf32> -> vector<1x64xf32>
    %52 = arith.mulf %50, %51 : vector<1x64xf32>
    %cst_26 = arith.constant 2.000000e+00 : f32
    %53 = vector.broadcast %cst_26 : f32 to vector<1x64xf32>
    %54 = arith.subf %53, %52 : vector<1x64xf32>
    %55 = arith.mulf %51, %54 : vector<1x64xf32>
    %56 = vector.broadcast %55 : vector<1x64xf32> to vector<8x64xf32>
    %57 = arith.mulf %48, %56 : vector<8x64xf32>
    %cst_27 = arith.constant dense<0.000000e+00> : vector<32x64xf32>
    %58 = tpu.matmul %5, %57, %cst_27 {dimension_numbers = #tpu.dot_dimension_numbers<[1], [0], [0], [1], [0, 0, 1, 1], [], []>} : vector<32x8xf32>, vector<8x64xf32>, vector<32x64xf32> -> vector<32x64xf32>
    %59 = vector.broadcast %6 : vector<32x1xf32> to vector<32x64xf32>
    %60 = arith.addf %58, %59 : vector<32x64xf32>
    %c0_28 = arith.constant 0 : index
    %c0_29 = arith.constant 0 : index
    %c0_30 = arith.constant 0 : index
    %61 = vector.load %arg9[%c0_28, %c0_29, %c0_30] : memref<2x32x64xf32, #tpu.memory_space<vmem>>, vector<1x32x64xf32>
    %62 = vector.shape_cast %61 : vector<1x32x64xf32> to vector<32x64xf32>
    %63 = vector.shape_cast %60 : vector<32x64xf32> to vector<1x32x64xf32>
    tpu.vector_store %arg9[%c0_28, %c0_29, %c0_30], %63 {strides = array<i32>} : memref<2x32x64xf32, #tpu.memory_space<vmem>>, vector<1x32x64xf32>,
    %c1 = arith.constant 1 : index
    %c0_31 = arith.constant 0 : index
    %c0_32 = arith.constant 0 : index
    %64 = vector.load %arg1[%c1, %c0_31, %c0_32] : memref<2x32x64xf32, #tpu.memory_space<vmem>>, vector<1x32x64xf32>
    %65 = vector.shape_cast %64 : vector<1x32x64xf32> to vector<32x64xf32>
    %cst_33 = arith.constant dense<0.000000e+00> : vector<32xf32>
    %66 = vector.multi_reduction <add>, %65, %cst_33 [1] : vector<32x64xf32> to vector<32xf32>
    %67 = vector.shape_cast %66 : vector<32xf32> to vector<32x1xf32>
    %68 = arith.mulf %65, %65 : vector<32x64xf32>
    %cst_34 = arith.constant dense<0.000000e+00> : vector<32xf32>
    %69 = vector.multi_reduction <add>, %68, %cst_34 [1] : vector<32x64xf32> to vector<32xf32>
    %70 = vector.shape_cast %69 : vector<32xf32> to vector<32x1xf32>
    %71 = vector.broadcast %67 : vector<32x1xf32> to vector<32x32xf32>
    %72 = arith.mulf %0, %71 : vector<32x32xf32>
    %cst_35 = arith.constant dense<0.000000e+00> : vector<32xf32>
    %73 = vector.multi_reduction <add>, %72, %cst_35 [0] : vector<32x32xf32> to vector<32xf32>
    %74 = vector.shape_cast %73 : vector<32xf32> to vector<1x32xf32>
    %cst_36 = arith.constant 7.812500e-03 : f32
    %75 = vector.broadcast %cst_36 : f32 to vector<1x32xf32>
    %76 = arith.mulf %74, %75 : vector<1x32xf32>
    %77 = vector.broadcast %70 : vector<32x1xf32> to vector<32x32xf32>
    %78 = arith.mulf %0, %77 : vector<32x32xf32>
    %cst_37 = arith.constant dense<0.000000e+00> : vector<32xf32>
    %79 = vector.multi_reduction <add>, %78, %cst_37 [0] : vector<32x32xf32> to vector<32xf32>
    %80 = vector.shape_cast %79 : vector<32xf32> to vector<1x32xf32>
    %cst_38 = arith.constant 7.812500e-03 : f32
    %81 = vector.broadcast %cst_38 : f32 to vector<1x32xf32>
    %82 = arith.mulf %80, %81 : vector<1x32xf32>
    %83 = arith.mulf %76, %76 : vector<1x32xf32>
    %84 = arith.subf %82, %83 : vector<1x32xf32>
    %cst_39 = arith.constant 9.99999974E-6 : f32
    %85 = vector.broadcast %cst_39 : f32 to vector<1x32xf32>
    %86 = arith.addf %84, %85 : vector<1x32xf32>
    %87 = math.rsqrt %86 : vector<1x32xf32>
    %88 = arith.mulf %87, %3 : vector<1x32xf32>
    %89 = arith.mulf %76, %88 : vector<1x32xf32>
    %90 = arith.subf %4, %89 : vector<1x32xf32>
    %91 = vector.broadcast %90 : vector<1x32xf32> to vector<8x32xf32>
    %92 = arith.mulf %1, %91 : vector<8x32xf32>
    %cst_40 = arith.constant dense<0.000000e+00> : vector<8xf32>
    %93 = vector.multi_reduction <add>, %92, %cst_40 [1] : vector<8x32xf32> to vector<8xf32>
    %94 = vector.shape_cast %93 : vector<8xf32> to vector<8x1xf32>
    %95 = arith.addf %94, %2 : vector<8x1xf32>
    %96 = vector.broadcast %88 : vector<1x32xf32> to vector<8x32xf32>
    %97 = arith.mulf %1, %96 : vector<8x32xf32>
    %cst_41 = arith.constant dense<0.000000e+00> : vector<8x64xf32>
    %98 = tpu.matmul %97, %65, %cst_41 {dimension_numbers = #tpu.dot_dimension_numbers<[1], [0], [0], [1], [0, 0, 1, 1], [], []>} : vector<8x32xf32>, vector<32x64xf32>, vector<8x64xf32> -> vector<8x64xf32>
    %99 = vector.broadcast %95 : vector<8x1xf32> to vector<8x64xf32>
    %100 = arith.addf %98, %99 : vector<8x64xf32>
    %cst_42 = arith.constant dense<0xFF800000> : vector<64xf32>
    %101 = vector.multi_reduction <maximumf>, %100, %cst_42 [0] : vector<8x64xf32> to vector<64xf32>
    %102 = vector.shape_cast %101 : vector<64xf32> to vector<1x64xf32>
    %103 = vector.broadcast %102 : vector<1x64xf32> to vector<8x64xf32>
    %104 = arith.subf %100, %103 : vector<8x64xf32>
    %105 = math.exp %104 : vector<8x64xf32>
    %cst_43 = arith.constant dense<0.000000e+00> : vector<64xf32>
    %106 = vector.multi_reduction <add>, %105, %cst_43 [0] : vector<8x64xf32> to vector<64xf32>
    %107 = vector.shape_cast %106 : vector<64xf32> to vector<1x64xf32>
    %108 = tpu.reciprocal %107 {approx = true} : vector<1x64xf32> -> vector<1x64xf32>
    %109 = arith.mulf %107, %108 : vector<1x64xf32>
    %cst_44 = arith.constant 2.000000e+00 : f32
    %110 = vector.broadcast %cst_44 : f32 to vector<1x64xf32>
    %111 = arith.subf %110, %109 : vector<1x64xf32>
    %112 = arith.mulf %108, %111 : vector<1x64xf32>
    %113 = vector.broadcast %112 : vector<1x64xf32> to vector<8x64xf32>
    %114 = arith.mulf %105, %113 : vector<8x64xf32>
    %cst_45 = arith.constant dense<0.000000e+00> : vector<32x64xf32>
    %115 = tpu.matmul %5, %114, %cst_45 {dimension_numbers = #tpu.dot_dimension_numbers<[1], [0], [0], [1], [0, 0, 1, 1], [], []>} : vector<32x8xf32>, vector<8x64xf32>, vector<32x64xf32> -> vector<32x64xf32>
    %116 = vector.broadcast %6 : vector<32x1xf32> to vector<32x64xf32>
    %117 = arith.addf %115, %116 : vector<32x64xf32>
    %c1_46 = arith.constant 1 : index
    %c0_47 = arith.constant 0 : index
    %c0_48 = arith.constant 0 : index
    %118 = vector.load %arg9[%c1_46, %c0_47, %c0_48] : memref<2x32x64xf32, #tpu.memory_space<vmem>>, vector<1x32x64xf32>
    %119 = vector.shape_cast %118 : vector<1x32x64xf32> to vector<32x64xf32>
    %120 = vector.shape_cast %117 : vector<32x64xf32> to vector<1x32x64xf32>
    tpu.vector_store %arg9[%c1_46, %c0_47, %c0_48], %120 {strides = array<i32>} : memref<2x32x64xf32, #tpu.memory_space<vmem>>, vector<1x32x64xf32>,
    return
  }
  func.func @transform_0(%arg0: i32) -> (i32, i32, i32) {
    %c0_i32 = arith.constant 0 : i32
    %c0_i32_0 = arith.constant 0 : i32
    %c0_i32_1 = arith.constant 0 : i32
    return %arg0, %c0_i32, %c0_i32_0 : i32, i32, i32
  }
  func.func @transform_1(%arg0: i32) -> (i32, i32) {
    %c0_i32 = arith.constant 0 : i32
    %c0_i32_0 = arith.constant 0 : i32
    %c0_i32_1 = arith.constant 0 : i32
    return %c0_i32, %c0_i32_0 : i32, i32
  }
  func.func @transform_2(%arg0: i32) -> (i32, i32) {
    %c0_i32 = arith.constant 0 : i32
    %c0_i32_0 = arith.constant 0 : i32
    %c0_i32_1 = arith.constant 0 : i32
    return %c0_i32, %c0_i32_0 : i32, i32
  }
  func.func @transform_3(%arg0: i32) -> (i32, i32) {
    %c0_i32 = arith.constant 0 : i32
    %c0_i32_0 = arith.constant 0 : i32
    %c0_i32_1 = arith.constant 0 : i32
    return %c0_i32, %c0_i32_0 : i32, i32
  }
  func.func @transform_4(%arg0: i32) -> (i32, i32) {
    %c0_i32 = arith.constant 0 : i32
    %c0_i32_0 = arith.constant 0 : i32
    %c0_i32_1 = arith.constant 0 : i32
    return %c0_i32, %c0_i32_0 : i32, i32
  }
  func.func @transform_5(%arg0: i32) -> (i32, i32) {
    %c0_i32 = arith.constant 0 : i32
    %c0_i32_0 = arith.constant 0 : i32
    %c0_i32_1 = arith.constant 0 : i32
    return %c0_i32, %c0_i32_0 : i32, i32
  }
  func.func @transform_6(%arg0: i32) -> (i32, i32) {
    %c0_i32 = arith.constant 0 : i32
    %c0_i32_0 = arith.constant 0 : i32
    %c0_i32_1 = arith.constant 0 : i32
    return %c0_i32, %c0_i32_0 : i32, i32
  }
  func.func @transform_7(%arg0: i32) -> (i32, i32) {
    %c0_i32 = arith.constant 0 : i32
    %c0_i32_0 = arith.constant 0 : i32
    %c0_i32_1 = arith.constant 0 : i32
    return %c0_i32, %c0_i32_0 : i32, i32
  }
  func.func @transform_8(%arg0: i32) -> (i32, i32, i32) {
    %c0_i32 = arith.constant 0 : i32
    %c0_i32_0 = arith.constant 0 : i32
    %c0_i32_1 = arith.constant 0 : i32
    return %arg0, %c0_i32, %c0_i32_0 : i32, i32, i32
  }
}

</mosaic_0001>

<bundles_post_ra>
// kernel: tpu_custom_call.1
= control target key start
LH: loop header
LB: loop body
LE: loop exit
PB: predicated region body
PF: predicated region fallthrough
CT: control target
= control target key end

     0   :  { %13 = vsyncpa [#allocation3], 0  ;;  %s1085_s0 = inlined_call_operand.vmem [shape: f32[2,32,64], index: 0, kind: input, shape index: {}]   ;;  %s1086_s1 = inlined_call_operand.hbm [shape: f32[32,32], index: 1, kind: input, shape index: {}]   ;;  %s1087_s2 = inlined_call_operand.vmem [shape: f32[1,32], index: 2, kind: input, shape index: {}]   ;;  %s1088_s3 = inlined_call_operand.vmem [shape: f32[1,32], index: 3, kind: input, shape index: {}]   ;;  %s1089_s4 = inlined_call_operand.vmem [shape: f32[8,32], index: 4, kind: input, shape index: {}]   ;;  %s1090_s5 = inlined_call_operand.vmem [shape: f32[8,1], index: 5, kind: input, shape index: {}]   ;;  %s1091_s6 = inlined_call_operand.vmem [shape: f32[32,8], index: 6, kind: input, shape index: {}]   ;;  %s1092_s7 = inlined_call_operand.vmem [shape: f32[32,1], index: 7, kind: input, shape index: {}]   ;;  %s1093_s8 = inlined_call_operand.hbm [shape: f32[2,32,64], index: 8, kind: output, shape index: {}]  }
   0x1   :  { %14 = vsyncpa [#allocation4], 0  ;;  %s813_s27 = smov [#allocation2]  }
   0x2   :  { %s22_s28 = sshll.u32 %s813_s27, 4  ;;  %s23_s28 = int_to_ptr.vmem [resolvable:$true] %s22_s28 }
   0x3   :  { %s777_s29 = scalar_lea.vmem %s23_s28, 512  ;;  %p782_p1 = scmp.lt.s32.totalorder %s23_s28, %s23_s28 }
   0x4   :  { %p778_p0 = scmp.ne.s32.totalorder %s23_s28, %s777_s29  ;;  %p783_p2 = scmp.lt.s32.totalorder %s777_s29, %s777_s29 }
   0x6   :  { %p784_p3 = por %p783_p2, %p782_p1 }
   0x8   :  { %p785_p4 = pnand %p784_p3, %p778_p0 }
   0xa   :  { %788 = shalt.err (!%p785_p4)
}
   0xb   :  { %s814_s30 = smov 128   ;;  %s815_s9 = smov 8  }
   0xc   :  { %28 = dma.hbm_to_vmem [thread:$0]  %s1086_s1, 512, %s23_s28, [#allocation3], %s814_s30, %s814_s30, %s815_s9  }
   0xd   :  { %809 = dma.done.wait [#allocation3], 512  }
   0xe   :  { %810 = vsyncadd [#allocation3], 4294966784  ;;  %vm64_vm0 = vcmask 523264   ;;  %v62_v0 = vld [vmem:[%s1085_s0 + $0x10] sm:$0xff]  ;;  %v60_v1 = vld [vmem:[%s1085_s0] sm:$0xff]  ;;  %v816_v16 = vmov 0.0  }
   0xf   :  { %v63_v2 = vld [vmem:[%s1085_s0 + $0x18] sm:$0xff]  ;;  %v71_v3 = vsel %vm64_vm0, %v62_v0, 0.0  ;;  %v65_v4 = vsel %vm64_vm0, %v60_v1, 0.0  ;;  %v61_v5 = vld [vmem:[%s1085_s0 + $0x8] sm:$0xff]  ;;  %v77_v8 = vmul.f32 %v60_v1, %v60_v1  ;;  %v79_v12 = vmul.f32 %v62_v0, %v62_v0  ;;  %708 = vmatprep.subr.mxu0 %v816_v16  ;;  %v897_v19 = vld [vmem:[#allocation2] sm:$0xff] }
  0x10   :  { %72 = vadd.xlane.f32.xlu1 %v71_v3  ;;  %66 = vadd.xlane.f32.xlu0 %v65_v4  ;;  %v74_v6 = vsel %vm64_vm0, %v63_v2, 0.0  ;;  %v68_v7 = vsel %vm64_vm0, %v61_v5, 0.0  ;;  %v78_v9 = vmul.f32 %v61_v5, %v61_v5  ;;  %v80_v13 = vmul.f32 %v63_v2, %v63_v2  ;;  %v899_v20 = vld [vmem:[#allocation2 + $0x10] sm:$0xff]  ;;  %v901_v21 = vld [vmem:[#allocation2 + $0x8] sm:$0xff]  ;;  %v904_v24 = vld [vmem:[#allocation2 + $0x18] sm:$0xff] }
  0x11   :  { %v81_v10 = vsel %vm64_vm0, %v77_v8, 0.0  ;;  %v87_v14 = vsel %vm64_vm0, %v79_v12, 0.0  ;;  %vm817_vm1 = vmmov 0   ;;  %709 = vmatpush3.msra.mxu0 %v63_v2  ;;  %vm97_vm2 = vcmask 261120  }
  0x12   :  { %v84_v11 = vsel %vm64_vm0, %v78_v9, 0.0  ;;  %v90_v15 = vsel %vm64_vm0, %v80_v13, 0.0  ;;  %716 = vmatprep.mubr.msk.f32.mxu0 %vm817_vm1, %v816_v16  ;;  %710 = vmatprep.subr.mxu0 %v816_v16  ;;  %v138_v4 = vlaneseq  ;;  %vm273_vm3 = vcmask 64512  }
  0x13   :  { %711 = vmatpush3.msra.mxu0 %v62_v0 }
  0x14   :  { %75 = vadd.xlane.f32.xlu1 %v74_v6  ;;  %69 = vadd.xlane.f32.xlu0 %v68_v7  ;;  %v924_v6 = vld [vmem:[%s1087_s2] sm:$0x1] }
  0x15   :  { %712 = vmatprep.subr.mxu0 %v816_v16 }
  0x16   :  { %713 = vmatpush3.msra.mxu0 %v61_v5  ;;  %v139_v5 = vshrl.u32 %v138_v4, 7 }
  0x17   :  { %714 = vmatprep.subr.mxu0 %v816_v16 }
  0x18   :  { %82 = vadd.xlane.f32.xlu1 %v81_v10  ;;  %85 = vadd.xlane.f32.xlu0 %v84_v11  ;;  %v926_v7 = vsub.s32 0, %v139_v5  ;;  %v932_v10 = vld [vmem:[%s1089_s4] sm:$0xff] }
  0x19   :  { %715 = vmatpush3.msra.mxu0 %v60_v1  ;;  %v937_v11 = vld [vmem:[%s1088_s3] sm:$0x1] }
  0x1c   :  { %88 = vadd.xlane.f32.xlu0 %v87_v14  ;;  %91 = vadd.xlane.f32.xlu1 %v90_v15 }
  0x99   :  { %v73_v17 = vpop.xlane.xlu1 %72  ;;  %v67_v18 = vpop.xlane.xlu0 %66 }
  0x9a   :  { %v93_v22 = vmul.f32 %v67_v18, %v897_v19  ;;  %v95_v26 = vmul.f32 %v73_v17, %v899_v20 }
  0x9c   :  { %v98_v28 = vsel %vm97_vm2, %v93_v22, 0.0  ;;  %v101_v34 = vsel %vm97_vm2, %v95_v26, 0.0  ;;  %v818_v26 = vmov 0  }
  0x9d   :  { %v76_v23 = vpop.xlane.xlu1 %75  ;;  %v70_v25 = vpop.xlane.xlu0 %69  ;;  %755 = vset.pattern.permute.xlu1 %v818_v26  ;;  %756 = vset.pattern.permute.xlu0 %v818_v26 }
  0x9e   :  { %v94_v27 = vmul.f32 %v70_v25, %v901_v21  ;;  %v96_v29 = vmul.f32 %v76_v23, %v904_v24  ;;  %v949_v23 = vld [vmem:[%s1085_s0 + $0x20] sm:$0xff] }
  0x9f   :  { %v380_v25 = vsel %vm64_vm0, %v949_v23, 0.0 }
  0xa0   :  { %v99_v30 = vsel %vm97_vm2, %v94_v27, 0.0  ;;  %v103_v38 = vsel %vm97_vm2, %v96_v29, 0.0  ;;  %v956_v27 = vld [vmem:[%s1085_s0 + $0x28] sm:$0xff] }
  0xa1   :  { %v100_v31 = vadd.f32 %v99_v30, %v98_v28  ;;  %v83_v32 = vpop.xlane.xlu1 %82  ;;  %v86_v33 = vpop.xlane.xlu0 %85  ;;  %v961_v28 = vld [vmem:[%s1085_s0 + $0x30] sm:$0xff]  ;;  %v383_v29 = vsel %vm64_vm0, %v956_v27, 0.0 }
  0xa2   :  { %v112_v35 = vmul.f32 %v83_v32, %v897_v19  ;;  %v113_v36 = vmul.f32 %v86_v33, %v901_v21  ;;  %v386_v30 = vsel %vm64_vm0, %v961_v28, 0.0  ;;  %v973_v33 = vld [vmem:[%s1085_s0 + $0x38] sm:$0xff] }
  0xa3   :  { %v102_v37 = vadd.f32 %v101_v34, %v100_v31  ;;  %v392_v31 = vmul.f32 %v949_v23, %v949_v23  ;;  %v389_v34 = vsel %vm64_vm0, %v973_v33, 0.0 }
  0xa4   :  { %v116_v39 = vsel %vm97_vm2, %v112_v35, 0.0  ;;  %v117_v40 = vsel %vm97_vm2, %v113_v36, 0.0  ;;  %v394_v35 = vmul.f32 %v961_v28, %v961_v28 }
  0xa5   :  { %v104_v41 = vadd.f32 %v103_v38, %v102_v37  ;;  %v89_v42 = vpop.xlane.xlu0 %88  ;;  %v92_v43 = vpop.xlane.xlu1 %91  ;;  %v118_v47 = vadd.f32 %v117_v40, %v116_v39  ;;  %v396_v32 = vsel %vm64_vm0, %v392_v31, 0.0  ;;  %v395_v37 = vmul.f32 %v973_v33, %v973_v33  ;;  %v986_v39 = vld [vmem:[%s1090_s5] sm:$0xff] }
  0xa6   :  { %v114_v44 = vmul.f32 %v89_v42, %v899_v20  ;;  %v115_v45 = vmul.f32 %v92_v43, %v904_v24  ;;  %v402_v36 = vsel %vm64_vm0, %v394_v35, 0.0  ;;  %v393_v42 = vmul.f32 %v956_v27, %v956_v27 }
  0xa7   :  { %v105_v46 = vrot.slane %v104_v41, 4  ;;  %v405_v38 = vsel %vm64_vm0, %v395_v37, 0.0 }
  0xa8   :  { %v119_v48 = vsel %vm97_vm2, %v114_v44, 0.0  ;;  %v121_v49 = vsel %vm97_vm2, %v115_v45, 0.0  ;;  %v399_v43 = vsel %vm64_vm0, %v393_v42, 0.0 }
  0xa9   :  { %v106_v50 = vadd.f32 %v105_v46, %v104_v41  ;;  %v120_v51 = vadd.f32 %v119_v48, %v118_v47  ;;  %v56_v46 = vld [vmem:[%s1092_s7] sm:$0xff]  ;;  %v57_v47 = vld [vmem:[%s1092_s7 + $0x8] sm:$0xff]  ;;  %v58_v48 = vld [vmem:[%s1092_s7 + $0x10] sm:$0xff] }
  0xab   :  { %v107_v52 = vrot.slane %v106_v50, 2  ;;  %v122_v53 = vadd.f32 %v121_v49, %v120_v51  ;;  %v59_v49 = vld [vmem:[%s1092_s7 + $0x18] sm:$0xff] }
  0xad   :  { %v108_v54 = vadd.f32 %v107_v52, %v106_v50  ;;  %v123_v55 = vrot.slane %v122_v53, 4  ;;  %v52_v50 = vld [vmem:[%s1091_s6] sm:$0xff] }
  0xae   :  { %721 = vmatprep.mubr.msk.f32.mxu1 %vm273_vm3, %v52_v50 }
  0xaf   :  { %v109_v56 = vrot.slane %v108_v54, 1  ;;  %v124_v57 = vadd.f32 %v123_v55, %v122_v53 }
  0xb1   :  { %v110_v58 = vadd.f32 %v109_v56, %v108_v54  ;;  %v125_v59 = vrot.slane %v124_v57, 2 }
  0xb3   :  { %v126_v60 = vadd.f32 %v125_v59, %v124_v57  ;;  %v111_v61 = vmul.f32 0.0078125, %v110_v58 }
  0xb5   :  { %v127_v62 = vrot.slane %v126_v60, 1  ;;  %v130_v1 = vmul.f32 %v111_v61, %v111_v61 }
  0xb7   :  { %v128_v63 = vadd.f32 %v127_v62, %v126_v60 }
  0xb9   :  { %v129_v0 = vmul.f32 0.0078125, %v128_v63 }
  0xbb   :  { %v131_v2 = vsub.f32 %v129_v0, %v130_v1 }
  0xbd   :  { %v132_v3 = vadd.f32 1e-05, %v131_v2 }
  0xbf   :  { %757 = vrsqrt.f32 %v132_v3 }
  0xcc   :  { %v758_v8 = vpop.eup %757 }
  0xcd   :  { %v134_v9 = vmul.f32 %v758_v8, %v924_v6 }
  0xcf   :  { %v151_v12 = vrot.slane %v134_v9, %v926_v7  ;;  %v135_v13 = vmul.f32 %v134_v9, %v111_v61 }
  0xd1   :  { %v152_v14 = vmul.f32 %v151_v12, %v932_v10  ;;  %v136_v15 = vsub.f32 %v937_v11, %v135_v13 }
  0xd3   :  { %717 = vmatmul.mubr.msk.f32.vlgmr.msra.gmra.mxu0 %vm97_vm2, %v152_v14  ;;  %v141_v17 = vrot.slane %v136_v15, %v926_v7 }
  0xd4   :  { %740 = vmatprep.mubr.msk.f32.mxu0 %vm273_vm3, %v52_v50 }
  0xd5   :  { %v143_v18 = vmul.f32 %v141_v17, %v932_v10 }
  0xd7   :  { %v144_v22 = vsel %vm97_vm2, %v143_v18, 0.0 }
  0xd8   :  { %145 = vadd.xlane.f32.xlu0 %v144_v22 }
  0xdc   :  { %381 = vadd.xlane.f32.xlu0 %v380_v25 }
  0xe0   :  { %384 = vadd.xlane.f32.xlu0 %v383_v29 }
  0xe4   :  { %387 = vadd.xlane.f32.xlu0 %v386_v30 }
  0xe8   :  { %397 = vadd.xlane.f32.xlu0 %v396_v32 }
  0xec   :  { %390 = vadd.xlane.f32.xlu0 %v389_v34 }
  0xf0   :  { %403 = vadd.xlane.f32.xlu0 %v402_v36 }
  0xf4   :  { %406 = vadd.xlane.f32.xlu0 %v405_v38 }
 0x161   :  { %v146_v40 = vpop.xlane.xlu0 %145 }
 0x162   :  { %v147_v41 = vadd.f32 %v146_v40, %v986_v39 }
 0x164   :  { %155 = vperm.xlu1 %755, %v147_v41  }
 0x165   :  { %v382_v56 = vpop.xlane.xlu0 %381 }
 0x166   :  { %v408_v2 = vmul.f32 %v382_v56, %v897_v19 }
 0x168   :  { %v412_v4 = vsel %vm97_vm2, %v408_v2, 0.0 }
 0x169   :  { %v385_v60 = vpop.xlane.xlu0 %384 }
 0x16a   :  { %v409_v3 = vmul.f32 %v385_v60, %v901_v21 }
 0x16c   :  { %v413_v5 = vsel %vm97_vm2, %v409_v3, 0.0 }
 0x16d   :  { %v388_v0 = vpop.xlane.xlu0 %387  ;;  %v414_v12 = vadd.f32 %v413_v5, %v412_v4  ;;  %v1042_v4 = vld [vmem:[%s1091_s6 + $0x18] sm:$0xff] }
 0x16e   :  { %v410_v8 = vmul.f32 %v388_v0, %v899_v20  ;;  %v54_v0 = vld [vmem:[%s1091_s6 + $0x10] sm:$0xff] }
 0x170   :  { %v415_v14 = vsel %vm97_vm2, %v410_v8, 0.0 }
 0x171   :  { %v398_v1 = vpop.xlane.xlu0 %397  ;;  %v416_v22 = vadd.f32 %v415_v14, %v414_v12 }
 0x172   :  { %v426_v40 = vmul.f32 %v398_v1, %v897_v19 }
 0x175   :  { %v391_v9 = vpop.xlane.xlu0 %390 }
 0x176   :  { %v411_v15 = vmul.f32 %v391_v9, %v904_v24 }
 0x178   :  { %v417_v25 = vsel %vm97_vm2, %v411_v15, 0.0 }
 0x179   :  { %v418_v30 = vadd.f32 %v417_v25, %v416_v22  ;;  %v404_v32 = vpop.xlane.xlu0 %403 }
 0x17b   :  { %v419_v35 = vrot.slane %v418_v30, 4 }
 0x17d   :  { %v420_v37 = vadd.f32 %v419_v35, %v418_v30  ;;  %v407_v38 = vpop.xlane.xlu0 %406 }
 0x188   :  { %400 = vadd.xlane.f32.xlu1 %v399_v43  ;;  %v428_v43 = vmul.f32 %v404_v32, %v899_v20 }
 0x193   :  { %v227_v44 = vpop.f32.mrf.mxu0 }
 0x195   :  { %v718_v45 = vpop.f32.mrf.mxu0 }
 0x196   :  { %v421_v45 = vrot.slane %v420_v37, 2 }
 0x199   :  { %255 = vperm.xlu1 %755, %v56_v46   ;;  %v430_v46 = vsel %vm97_vm2, %v426_v40, 0.0 }
 0x19d   :  { %260 = vperm.xlu1 %755, %v57_v47  }
 0x1a1   :  { %265 = vperm.xlu1 %755, %v58_v48  }
 0x1a5   :  { %270 = vperm.xlu1 %755, %v59_v49   ;;  %v433_v49 = vsel %vm97_vm2, %v428_v43, 0.0 }
 0x1df   :  { %v156_v51 = vpop.permute.xlu1 %155 }
 0x1e0   :  { %v228_v52 = vadd.f32 %v227_v44, %v156_v51  ;;  %v429_v44 = vmul.f32 %v407_v38, %v904_v24  ;;  %v422_v51 = vadd.f32 %v421_v45, %v420_v37 }
 0x1e2   :  { %v231_v53 = vsel %vm64_vm0, %v228_v52, -inf  ;;  %v435_v50 = vsel %vm97_vm2, %v429_v44, 0.0 }
 0x1e3   :  { %v232_v54 = vrot.slane %v231_v53, 4 }
 0x1e5   :  { %v233_v55 = vmax.f32 %v231_v53, %v232_v54  ;;  %v423_v54 = vrot.slane %v422_v51, 1 }
 0x1e7   :  { %v234_v57 = vrot.slane %v233_v55, 2  ;;  %v424_v24 = vadd.f32 %v423_v54, %v422_v51 }
 0x1e9   :  { %v235_v58 = vmax.f32 %v233_v55, %v234_v57 }
 0x1eb   :  { %v236_v59 = vrot.slane %v235_v58, 1 }
 0x1ed   :  { %v237_v61 = vmax.f32 %v235_v58, %v236_v59 }
 0x1ef   :  { %v238_v62 = vsub.f32 %v228_v52, %v237_v61  ;;  %v425_v61 = vmul.f32 0.0078125, %v424_v24 }
 0x1f1   :  { %v239_v63 = vmul.f32 1.442695, %v238_v62  ;;  %v444_v2 = vmul.f32 %v425_v61, %v425_v61 }
 0x1f3   :  { %759 = vpow2.f32 %v239_v63  ;;  %v1030_v63 = vld [vmem:[%s1091_s6 + $0x8] sm:$0xff]  ;;  %s819_s6 = smov [#allocation5]  }
 0x1f4   :  { %s662_s24 = sshll.u32 %s819_s6, 4  ;;  %s663_s24 = int_to_ptr.vmem [resolvable:$true] %s662_s24 }
 0x1f5   :  { %s789_s2 = scalar_lea.vmem %s663_s24, 1024  ;;  %p794_p6 = scmp.lt.s32.totalorder %s663_s24, %s663_s24 }
 0x1f6   :  { %p790_p5 = scmp.ne.s32.totalorder %s663_s24, %s789_s2  ;;  %p795_p7 = scmp.lt.s32.totalorder %s789_s2, %s789_s2 }
 0x1f8   :  { %p796_p8 = por %p795_p7, %p794_p6 }
 0x1fa   :  { %p797_p9 = pnand %p796_p8, %p790_p5 }
 0x200   :  { %v760_v13 = vpop.eup %759 }
 0x201   :  { %v241_v17 = vsel %vm64_vm0, %v760_v13, 0.0 }
 0x202   :  { %v242_v18 = vrot.slane %v241_v17, 4 }
 0x204   :  { %v243_v26 = vadd.f32 %v242_v18, %v241_v17 }
 0x206   :  { %v244_v29 = vrot.slane %v243_v26, 2 }
 0x208   :  { %v245_v31 = vadd.f32 %v244_v29, %v243_v26 }
 0x20a   :  { %v246_v34 = vrot.slane %v245_v31, 1 }
 0x20c   :  { %v247_v36 = vadd.f32 %v246_v34, %v245_v31 }
 0x20e   :  { %761 = vrcp.f32 %v247_v36 }
 0x211   :  { %v401_v41 = vpop.xlane.xlu1 %400 }
 0x212   :  { %v427_v42 = vmul.f32 %v401_v41, %v901_v21 }
 0x214   :  { %v431_v47 = vsel %vm97_vm2, %v427_v42, 0.0 }
 0x215   :  { %v432_v48 = vadd.f32 %v431_v47, %v430_v46  ;;  %v256_v17 = vpop.permute.xlu1 %255 }
 0x217   :  { %v434_v52 = vadd.f32 %v433_v49, %v432_v48 }
 0x219   :  { %v436_v19 = vadd.f32 %v435_v50, %v434_v52  ;;  %v261_v18 = vpop.permute.xlu1 %260 }
 0x21b   :  { %v762_v53 = vpop.eup %761  ;;  %v437_v21 = vrot.slane %v436_v19, 4 }
 0x21c   :  { %v249_v55 = vmul.f32 %v762_v53, %v247_v36 }
 0x21d   :  { %v438_v20 = vadd.f32 %v437_v21, %v436_v19  ;;  %v266_v22 = vpop.permute.xlu1 %265 }
 0x21e   :  { %v250_v56 = vsub.f32 2.0, %v249_v55 }
 0x21f   :  { %v439_v57 = vrot.slane %v438_v20, 2 }
 0x220   :  { %v251_v58 = vmul.f32 %v762_v53, %v250_v56 }
 0x221   :  { %v440_v59 = vadd.f32 %v439_v57, %v438_v20  ;;  %v271_v29 = vpop.permute.xlu1 %270 }
 0x222   :  { %v252_v60 = vmul.f32 %v760_v13, %v251_v58 }
 0x223   :  { %v441_v62 = vrot.slane %v440_v59, 1 }
 0x224   :  { %719 = vmatprep.subr.mxu1 %v252_v60 }
 0x225   :  { %v442_v1 = vadd.f32 %v441_v62, %v440_v59  ;;  %720 = vmatpush3.msra.mxu1 %v252_v60 }
 0x226   :  { %722 = vmatmul.mubr.msk.f32.vlgmr.msra.gmra.mxu1 %vm273_vm3, %v1030_v63  ;;  %727 = vmatprep.subr.mxu1 %v816_v16 }
 0x227   :  { %v443_v3 = vmul.f32 0.0078125, %v442_v1  ;;  %724 = vmatprep.mubr.msk.f32.mxu1 %vm273_vm3, %v54_v0  ;;  %728 = vmatpush3.msra.mxu1 %v973_v33 }
 0x228   :  { %729 = vmatprep.subr.mxu1 %v816_v16 }
 0x229   :  { %v445_v5 = vsub.f32 %v443_v3, %v444_v2  ;;  %730 = vmatpush3.msra.mxu1 %v961_v28 }
 0x22a   :  { %725 = vmatmul.mubr.msk.f32.gmra.mxu1 %vm273_vm3, %v1042_v4  ;;  %731 = vmatprep.subr.mxu1 %v816_v16 }
 0x22b   :  { %v446_v8 = vadd.f32 1e-05, %v445_v5  ;;  %732 = vmatpush3.msra.mxu1 %v956_v27  ;;  %735 = vmatprep.mubr.msk.f32.mxu1 %vm817_vm1, %v816_v16 }
 0x22c   :  { %733 = vmatprep.subr.mxu1 %v816_v16 }
 0x22d   :  { %763 = vrsqrt.f32 %v446_v8  ;;  %734 = vmatpush3.msra.mxu1 %v949_v23 }
 0x23a   :  { %v764_v33 = vpop.eup %763 }
 0x23b   :  { %v448_v9 = vmul.f32 %v764_v33, %v924_v6 }
 0x23d   :  { %v465_v28 = vrot.slane %v448_v9, %v926_v7  ;;  %v449_v12 = vmul.f32 %v448_v9, %v425_v61 }
 0x23f   :  { %v466_v13 = vmul.f32 %v465_v28, %v932_v10  ;;  %v450_v14 = vsub.f32 %v937_v11, %v449_v12 }
 0x241   :  { %736 = vmatmul.mubr.msk.f32.vlgmr.msra.gmra.mxu1 %vm97_vm2, %v466_v13  ;;  %v455_v27 = vrot.slane %v450_v14, %v926_v7 }
 0x242   :  { %743 = vmatprep.mubr.msk.f32.mxu1 %vm273_vm3, %v54_v0 }
 0x243   :  { %v457_v16 = vmul.f32 %v455_v27, %v932_v10 }
 0x245   :  { %v458_v23 = vsel %vm97_vm2, %v457_v16, 0.0 }
 0x246   :  { %459 = vadd.xlane.f32.xlu0 %v458_v23 }
 0x2cf   :  { %v460_v15 = vpop.xlane.xlu0 %459 }
 0x2d0   :  { %v461_v6 = vadd.f32 %v460_v15, %v986_v39 }
 0x2d2   :  { %469 = vperm.xlu0 %756, %v461_v6  }
 0x2e6   :  { %v723_v25 = vpop.f32.mrf.mxu1 }
 0x2e7   :  { %v358_v11 = vadd.f32 %v723_v25, %v261_v18 }
 0x2e8   :  { %v352_v26 = vpop.f32.mrf.mxu1 }
 0x2e9   :  { %372 = vst.msk [vmem:[#allocation5 + $0x8] sm:$0xff] %vm64_vm0, %v358_v11  ;;  %v353_v7 = vadd.f32 %v352_v26, %v256_v17 }
 0x2ea   :  { %v726_v30 = vpop.f32.mrf.mxu1 }
 0x2eb   :  { %371 = vst.msk [vmem:[#allocation5] sm:$0xff] %vm64_vm0, %v353_v7  ;;  %v368_v10 = vadd.f32 %v726_v30, %v271_v29 }
 0x2ec   :  { %v362_v31 = vpop.f32.mrf.mxu1 }
 0x2ed   :  { %374 = vst.msk [vmem:[#allocation5 + $0x18] sm:$0xff] %vm64_vm0, %v368_v10  ;;  %v363_v32 = vadd.f32 %v362_v31, %v266_v22 }
 0x2ef   :  { %373 = vst.msk [vmem:[#allocation5 + $0x10] sm:$0xff] %vm64_vm0, %v363_v32 }
 0x301   :  { %v541_v39 = vpop.f32.mrf.mxu1 }
 0x303   :  { %v737_v34 = vpop.f32.mrf.mxu1 }
 0x34d   :  { %v470_v35 = vpop.permute.xlu0 %469 }
 0x34e   :  { %v542_v36 = vadd.f32 %v541_v39, %v470_v35 }
 0x350   :  { %v545_v37 = vsel %vm64_vm0, %v542_v36, -inf }
 0x351   :  { %v546_v38 = vrot.slane %v545_v37, 4 }
 0x353   :  { %v547_v40 = vmax.f32 %v545_v37, %v546_v38 }
 0x355   :  { %v548_v41 = vrot.slane %v547_v40, 2 }
 0x357   :  { %v549_v42 = vmax.f32 %v547_v40, %v548_v41 }
 0x359   :  { %v550_v43 = vrot.slane %v549_v42, 1 }
 0x35b   :  { %v551_v44 = vmax.f32 %v549_v42, %v550_v43 }
 0x35d   :  { %v552_v45 = vsub.f32 %v542_v36, %v551_v44 }
 0x35f   :  { %v553_v46 = vmul.f32 1.442695, %v552_v45 }
 0x361   :  { %765 = vpow2.f32 %v553_v46 }
 0x36e   :  { %v766_v47 = vpop.eup %765 }
 0x36f   :  { %v555_v48 = vsel %vm64_vm0, %v766_v47, 0.0 }
 0x370   :  { %v556_v49 = vrot.slane %v555_v48, 4 }
 0x372   :  { %v557_v50 = vadd.f32 %v556_v49, %v555_v48 }
 0x374   :  { %v558_v51 = vrot.slane %v557_v50, 2 }
 0x376   :  { %v559_v52 = vadd.f32 %v558_v51, %v557_v50 }
 0x378   :  { %v560_v19 = vrot.slane %v559_v52, 1 }
 0x37a   :  { %v561_v53 = vadd.f32 %v560_v19, %v559_v52 }
 0x37c   :  { %767 = vrcp.f32 %v561_v53 }
 0x389   :  { %v768_v54 = vpop.eup %767 }
 0x38a   :  { %v563_v21 = vmul.f32 %v768_v54, %v561_v53 }
 0x38c   :  { %v564_v55 = vsub.f32 2.0, %v563_v21 }
 0x38e   :  { %v565_v20 = vmul.f32 %v768_v54, %v564_v55 }
 0x390   :  { %v566_v56 = vmul.f32 %v766_v47, %v565_v20 }
 0x392   :  { %738 = vmatprep.subr.mxu0 %v566_v56  ;;  %746 = vmatprep.subr.mxu1 %v566_v56 }
 0x393   :  { %739 = vmatpush3.msra.mxu0 %v566_v56  ;;  %747 = vmatpush3.msra.mxu1 %v566_v56 }
 0x394   :  { %741 = vmatmul.mubr.msk.f32.vlgmr.msra.gmra.mxu0 %vm273_vm3, %v1030_v63  ;;  %744 = vmatmul.mubr.msk.f32.vlgmr.msra.gmra.mxu1 %vm273_vm3, %v1042_v4 }
 0x454   :  { %v742_v24 = vpop.f32.mrf.mxu0  ;;  %v745_v57 = vpop.f32.mrf.mxu1 }
 0x455   :  { %v639_v58 = vadd.f32 %v742_v24, %v261_v18  ;;  %v649_v59 = vadd.f32 %v745_v57, %v271_v29 }
 0x456   :  { %v633_v60 = vpop.f32.mrf.mxu0  ;;  %v643_v61 = vpop.f32.mrf.mxu1 }
 0x457   :  { %654 = vst.msk [vmem:[#allocation5 + $0x28] sm:$0xff] %vm64_vm0, %v639_v58  ;;  %656 = vst.msk [vmem:[#allocation5 + $0x38] sm:$0xff] %vm64_vm0, %v649_v59  ;;  %v634_v62 = vadd.f32 %v633_v60, %v256_v17  ;;  %v644_v0 = vadd.f32 %v643_v61, %v266_v22 }
 0x459   :  { %653 = vst.msk [vmem:[#allocation5 + $0x20] sm:$0xff] %vm64_vm0, %v634_v62  ;;  %655 = vst.msk [vmem:[#allocation5 + $0x30] sm:$0xff] %vm64_vm0, %v644_v0 }
 0x45a   :  { %800 = shalt.err (!%p797_p9)
}
 0x45b   :  { %668 = dma.vmem_to_hbm [thread:$0]  %s663_s24, 1024, %s1093_s8, [#allocation4], %s814_s30, %s814_s30, %s815_s9  }
 0x45c   :  { %811 = dma.done.wait [#allocation4], 1024  }
 0x45d   :  { %812 = vsyncadd [#allocation4], 4294966272 }
 0x45e   :  { %672 = vsyncpa [#allocation3], 1 }
 0x45f   :  { %673 = vsyncpa [#allocation4], 1 }

</bundles_post_ra>
